<compile_context>
chip_gen: v7x
topology: tpu7x:2x2x1
jax: 0.10.0
libtpu: 0.0.40
codegen_flags: <defaults>
</compile_context>

<pallas_src>
import math

import jax
import jax.numpy as jnp
from jax.experimental import pallas as pl
from jax.experimental.pallas import tpu as pltpu


def _input_mapping_kernel(x_ref, b_ref, o_ref):
    # x_ref: (tm, dim)   b_ref: (dim, M) -- already scaled by 2*pi
    # o_ref: (tm, 2*M)
    dim = x_ref.shape[1]
    m = b_ref.shape[1]

    x = x_ref[...].astype(jnp.float32)          # (tm, dim)
    b = b_ref[...].astype(jnp.float32)          # (dim, M)

    if dim <= 8:
        # K is tiny: an MXU matmul would be pure setup/drain latency. Do a
        # short unrolled VPU outer-product accumulate instead.
        x_proj = x[:, 0:1] * b[0:1, :]
        for d in range(1, dim):
            x_proj = x_proj + x[:, d:d + 1] * b[d:d + 1, :]
    else:
        x_proj = jnp.dot(x, b, preferred_element_type=jnp.float32)

    # Shared mod-2*pi range reduction, computed once for both sin and cos.
    two_pi = jnp.float32(2.0 * math.pi)
    inv_two_pi = jnp.float32(1.0 / (2.0 * math.pi))
    r = x_proj - two_pi * jnp.round(x_proj * inv_two_pi)

    s = jnp.sin(r).astype(o_ref.dtype)
    c = jnp.cos(r).astype(o_ref.dtype)

    if m % 128 == 0:
        # Both halves start at lane-aligned offsets -> unmasked stores.
        o_ref[:, :m] = s
        o_ref[:, m:] = c
    else:
        # Single full-tile store keeps the write lane-dense even if the cos
        # half would otherwise start at an unaligned lane offset.
        o_ref[...] = jnp.concatenate([s, c], axis=-1)


def input_mapping(x, B, *, tm=1024):
    """Fourier feature input mapping.

    x: (N, dim) float32, B: (dim, mapping_size) float32.
    Returns (N, 2*mapping_size) float32.
    """
    N, dim = x.shape
    dim_b, M = B.shape
    assert dim == dim_b, (dim, dim_b)

    # Fold the 2*pi scale into B once (amortized over all calls in a model).
    B_scaled = (2.0 * math.pi) * B.astype(jnp.float32)

    # Effective row tile: multiple of 8, capped so tiny N doesn't over-pad.
    n_rounded = pl.cdiv(N, 8) * 8
    tm_eff = max(8, (min(tm, n_rounded) // 8) * 8)

    # Pad N up to a tile multiple instead of asserting divisibility.
    n_pad = pl.cdiv(N, tm_eff) * tm_eff
    x_p = x if n_pad == N else jnp.pad(x, ((0, n_pad - N), (0, 0)))

    grid = (n_pad // tm_eff,)

    cost = pl.CostEstimate(
        flops=2 * N * dim * M,
        transcendentals=2 * N * M,
        bytes_accessed=4 * (N * dim + dim * M + 2 * N * M),
    )

    out = pl.pallas_call(
        _input_mapping_kernel,
        out_shape=jax.ShapeDtypeStruct((n_pad, 2 * M), jnp.float32),
        grid_spec=pltpu.PrefetchScalarGridSpec(
            num_scalar_prefetch=0,
            grid=grid,
            in_specs=[
                # x tile: (tm_eff, dim). dim equals the full last dim, so no
                # (8,128) divisibility requirement on it.
                pl.BlockSpec((tm_eff, dim), lambda i: (i, 0)),
                # B is small and reused by every row tile: keep it resident.
                pl.BlockSpec((dim, M), lambda i: (0, 0)),
            ],
            # Lane-dense output tile: block spans the full 2*M last dim.
            out_specs=pl.BlockSpec((tm_eff, 2 * M), lambda i: (i, 0)),
        ),
        compiler_params=pltpu.CompilerParams(
            dimension_semantics=("parallel",),
        ),
        cost_estimate=cost,
    )(x_p, B_scaled)

    return out[:N] if n_pad != N else out


def input_mapping_ref(x, B):
    x_proj = (2.0 * math.pi * x) @ B
    return jnp.concatenate([jnp.sin(x_proj), jnp.cos(x_proj)], axis=-1)


if __name__ == "__main__":
    key = jax.random.PRNGKey(0)
    k_b, k_x = jax.random.split(key)

    # Module defaults: dim=2, mapping_size=256, B='gaussian', sigma=10.
    dim = 2
    mapping_size = 256
    sigma = 10.0
    B = jax.random.normal(k_b, (dim, mapping_size), dtype=jnp.float32) * sigma

    # Small batch of 2-D coordinates (N intentionally not a tile multiple).
    N = 16
    x = jax.random.normal(k_x, (N, dim), dtype=jnp.float32)

    out = input_mapping(x, B)
    out = jax.block_until_ready(out)

    ref = input_mapping_ref(x, B)
    assert out.shape == (N, 2 * mapping_size), out.shape
    assert jnp.allclose(out, ref, atol=2e-4, rtol=1e-4), "mismatch vs reference"

    # Exercise the multi-tile + padding path with a tiny forced tile size.
    N2 = 20
    x2 = jax.random.normal(jax.random.PRNGKey(1), (N2, dim), dtype=jnp.float32)
    out2 = jax.block_until_ready(input_mapping(x2, B, tm=8))
    ref2 = input_mapping_ref(x2, B)
    assert out2.shape == (N2, 2 * mapping_size), out2.shape
    assert jnp.allclose(out2, ref2, atol=2e-4, rtol=1e-4), "mismatch (tiled path)"

    print("KERNEL_OK")
</pallas_src>

<mosaic_0001>
module attributes {stable_mosaic.version = 11 : i64} {
  func.func @_input_mapping_kernel(%arg0: i32, %arg1: memref<16x2xf32, #tpu.memory_space<vmem>>, %arg2: memref<2x256xf32, #tpu.memory_space<vmem>>, %arg3: memref<16x512xf32, #tpu.memory_space<vmem>>) attributes {dimension_semantics = [#tpu.dimension_semantics<parallel>], iteration_bounds = array<i64: 1>, scalar_prefetch = 0 : i64, scratch_operands = 0 : i64, tpu.core_type = #tpu.core_type<tc>, window_params = [{transform_indices = @transform_0, window_bounds = array<i64: 16, 2>}, {pipeline_mode = #tpu.pipeline_mode<synchronous>, transform_indices = @transform_1, window_bounds = array<i64: 2, 256>}, {transform_indices = @transform_2, window_bounds = array<i64: 16, 512>}]} {
    %c0 = arith.constant 0 : index
    %c0_0 = arith.constant 0 : index
    %0 = vector.load %arg1[%c0, %c0_0] : memref<16x2xf32, #tpu.memory_space<vmem>>, vector<16x2xf32>
    %c0_1 = arith.constant 0 : index
    %c0_2 = arith.constant 0 : index
    %1 = vector.load %arg2[%c0_1, %c0_2] : memref<2x256xf32, #tpu.memory_space<vmem>>, vector<2x256xf32>
    %2 = vector.extract_strided_slice %0 {offsets = [0, 0], sizes = [16, 1], strides = [1, 1]} : vector<16x2xf32> to vector<16x1xf32>
    %3 = vector.extract_strided_slice %1 {offsets = [0, 0], sizes = [1, 256], strides = [1, 1]} : vector<2x256xf32> to vector<1x256xf32>
    %4 = vector.broadcast %2 : vector<16x1xf32> to vector<16x256xf32>
    %5 = vector.broadcast %3 : vector<1x256xf32> to vector<16x256xf32>
    %6 = arith.mulf %4, %5 : vector<16x256xf32>
    %7 = vector.extract_strided_slice %0 {offsets = [0, 1], sizes = [16, 1], strides = [1, 1]} : vector<16x2xf32> to vector<16x1xf32>
    %8 = vector.extract_strided_slice %1 {offsets = [1, 0], sizes = [1, 256], strides = [1, 1]} : vector<2x256xf32> to vector<1x256xf32>
    %9 = vector.broadcast %7 : vector<16x1xf32> to vector<16x256xf32>
    %10 = vector.broadcast %8 : vector<1x256xf32> to vector<16x256xf32>
    %11 = arith.mulf %9, %10 : vector<16x256xf32>
    %12 = arith.addf %6, %11 : vector<16x256xf32>
    %cst = arith.constant 0.159154937 : f32
    %13 = vector.broadcast %cst : f32 to vector<16x256xf32>
    %14 = arith.mulf %12, %13 : vector<16x256xf32>
    %15 = math.roundeven %14 : vector<16x256xf32>
    %cst_3 = arith.constant 6.28318548 : f32
    %16 = vector.broadcast %cst_3 : f32 to vector<16x256xf32>
    %17 = arith.mulf %16, %15 : vector<16x256xf32>
    %18 = arith.subf %12, %17 : vector<16x256xf32>
    %19 = math.sin %18 : vector<16x256xf32>
    %20 = math.cos %18 : vector<16x256xf32>
    %c0_4 = arith.constant 0 : index
    %c0_5 = arith.constant 0 : index
    %21 = vector.load %arg3[%c0_4, %c0_5] : memref<16x512xf32, #tpu.memory_space<vmem>>, vector<16x256xf32>
    tpu.vector_store %arg3[%c0_4, %c0_5], %19 {strides = array<i32>} : memref<16x512xf32, #tpu.memory_space<vmem>>, vector<16x256xf32>,
    %c0_6 = arith.constant 0 : index
    %c256 = arith.constant 256 : index
    %22 = vector.load %arg3[%c0_6, %c256] : memref<16x512xf32, #tpu.memory_space<vmem>>, vector<16x256xf32>
    tpu.vector_store %arg3[%c0_6, %c256], %20 {strides = array<i32>} : memref<16x512xf32, #tpu.memory_space<vmem>>, vector<16x256xf32>,
    return
  }
  func.func @transform_0(%arg0: i32) -> (i32, i32) {
    %c0_i32 = arith.constant 0 : i32
    %c0_i32_0 = arith.constant 0 : i32
    return %arg0, %c0_i32 : i32, i32
  }
  func.func @transform_1(%arg0: i32) -> (i32, i32) {
    %c0_i32 = arith.constant 0 : i32
    %c0_i32_0 = arith.constant 0 : i32
    %c0_i32_1 = arith.constant 0 : i32
    return %c0_i32, %c0_i32_0 : i32, i32
  }
  func.func @transform_2(%arg0: i32) -> (i32, i32) {
    %c0_i32 = arith.constant 0 : i32
    %c0_i32_0 = arith.constant 0 : i32
    return %arg0, %c0_i32 : i32, i32
  }
}

</mosaic_0001>

<bundles_post_ra>
// kernel: tpu_custom_call.1
= control target key start
LH: loop header
LB: loop body
LE: loop exit
PB: predicated region body
PF: predicated region fallthrough
CT: control target
= control target key end

     0   :  { %v1056_v1 = vmov 1   ;;  %v1057_v2 = vmov 0   ;;  %s1453_s0 = inlined_call_operand.vmem [shape: f32[16,2], index: 0, kind: input, shape index: {}]   ;;  %s1454_s1 = inlined_call_operand.vmem [shape: f32[2,256], index: 1, kind: input, shape index: {}]   ;;  %s1455_s2 = inlined_call_operand.hbm [shape: f32[16,512], index: 2, kind: output, shape index: {}]  }
   0x1   :  { %v12_v0 = vld [vmem:[%s1453_s0] sm:$0xff]  ;;  %1014 = vset.pattern.permute.xlu1 %v1056_v1  ;;  %1013 = vset.pattern.permute.xlu0 %v1057_v2 }
   0x2   :  { %7 = vsyncpa [#allocation3], 0  ;;  %49 = vperm.xlu1 %1014, %v12_v0   ;;  %17 = vperm.xlu0 %1013, %v12_v0   ;;  %v13_v3 = vld [vmem:[%s1453_s0 + $0x8] sm:$0xff]  ;;  %v26_v4 = vlaneseq  ;;  %v14_v10 = vld [vmem:[%s1454_s1] sm:$0xf]  ;;  %s1064_s0 = smov [#allocation2]  }
   0x3   :  { %s939_s1 = sshll.u32 %s1064_s0, 4  ;;  %s940_s1 = int_to_ptr.vmem [resolvable:$true] %s939_s1 }
   0x4   :  { %v27_v5 = vshrl.u32 %v26_v4, 7  ;;  %s1032_s15 = scalar_lea.vmem %s940_s1, 1024  ;;  %p1037_p1 = scmp.lt.s32.totalorder %s940_s1, %s940_s1 }
   0x5   :  { %p1033_p0 = scmp.ne.s32.totalorder %s940_s1, %s1032_s15  ;;  %p1038_p2 = scmp.lt.s32.totalorder %s1032_s15, %s1032_s15 }
   0x6   :  { %53 = vperm.xlu1 %1014, %v13_v3   ;;  %22 = vperm.xlu0 %1013, %v13_v3   ;;  %v58_v6 = vsub.s32 1, %v27_v5  ;;  %v62_v7 = vsub.s32 3, %v27_v5  ;;  %v28_v8 = vsub.s32 0, %v27_v5  ;;  %v32_v9 = vsub.s32 2, %v27_v5 }
   0x7   :  { %p1039_p3 = por %p1038_p2, %p1037_p1 }
   0x8   :  { %v59_v11 = vrot.slane %v14_v10, %v58_v6  ;;  %v63_v12 = vrot.slane %v14_v10, %v62_v7  ;;  %v29_v13 = vrot.slane %v14_v10, %v28_v8  ;;  %v33_v14 = vrot.slane %v14_v10, %v32_v9 }
   0x9   :  { %v1058_v10 = vmov 683565275   ;;  %p1040_p4 = pnand %p1039_p3, %p1033_p0 }
   0xa   :  { %1015 = vset.pattern.permute.xlu0 %v1056_v1  ;;  %v69_v15 = vrot.slane %v59_v11, %v58_v6  ;;  %v73_v16 = vrot.slane %v63_v12, %v58_v6  ;;  %v39_v17 = vrot.slane %v29_v13, %v28_v8  ;;  %v43_v18 = vrot.slane %v33_v14, %v28_v8 }
   0xb   :  { %v1059_v14 = vmov 2475754826  }
  0x81   :  { %v50_v19 = vpop.permute.xlu1 %49  ;;  %v18_v20 = vpop.permute.xlu0 %17 }
  0x82   :  { %v74_v21 = vmul.f32 %v69_v15, %v50_v19  ;;  %v75_v22 = vmul.f32 %v73_v16, %v50_v19  ;;  %v44_v23 = vmul.f32 %v39_v17, %v18_v20  ;;  %v45_v24 = vmul.f32 %v43_v18, %v18_v20 }
  0x83   :  { %v1062_v20 = vmov 920167782  }
  0x84   :  { %v78_v25 = vadd.f32 %v74_v21, %v44_v23  ;;  %v79_v26 = vadd.f32 %v75_v22, %v45_v24 }
  0x85   :  { %v54_v27 = vpop.permute.xlu1 %53  ;;  %v23_v28 = vpop.permute.xlu0 %22 }
  0x86   :  { %v82_v29 = vmul.f32 0.15915494, %v78_v25  ;;  %v83_v30 = vmul.f32 0.15915494, %v79_v26  ;;  %v76_v31 = vmul.f32 %v69_v15, %v54_v27  ;;  %v46_v32 = vmul.f32 %v39_v17, %v23_v28 }
  0x87   :  { %v77_v35 = vmul.f32 %v73_v16, %v54_v27  ;;  %v47_v36 = vmul.f32 %v43_v18, %v23_v28  ;;  %v1060_v16 = vmov 2131351028   ;;  %v1061_v18 = vmov 2102212464  }
  0x88   :  { %v982_v33 = vround.rtne.f32 %v82_v29  ;;  %v983_v34 = vround.rtne.f32 %v83_v30  ;;  %v80_v37 = vadd.f32 %v76_v31, %v46_v32  ;;  %v1063_v27 = vmov 1326507024  }
  0x89   :  { %v1095_v43 = vadd.f32 %v77_v35, %v47_v36 }
  0x8a   :  { %v90_v38 = vmul.f32 6.2831855, %v982_v33  ;;  %v91_v39 = vmul.f32 6.2831855, %v983_v34  ;;  %v84_v40 = vmul.f32 0.15915494, %v80_v37 }
  0x8b   :  { %v85_v50 = vmul.f32 0.15915494, %v1095_v43 }
  0x8c   :  { %v1091_v41 = vsub.f32 %v78_v25, %v90_v38  ;;  %v1093_v42 = vsub.f32 %v79_v26, %v91_v39  ;;  %v984_v46 = vround.rtne.f32 %v84_v40 }
  0x8d   :  { %v985_v58 = vround.rtne.f32 %v85_v50 }
  0x8e   :  { %v98_v44 = vand.u32 2147483647, %v1091_v41  ;;  %v101_v45 = vand.u32 2139095040, %v1091_v41  ;;  %v202_v47 = vand.u32 2147483647, %v1093_v42  ;;  %v205_v48 = vand.u32 2139095040, %v1093_v42 }
  0x8f   :  { %v92_v55 = vmul.f32 6.2831855, %v984_v46  ;;  %v1109_v4 = vmul.f32 6.2831855, %v985_v58  ;;  %vm100_vm13 = vcmp.lt.s32.totalorder %v1091_v41, 0  ;;  %vm204_vm14 = vcmp.lt.s32.totalorder %v1093_v42, 0 }
  0x90   :  { %v102_v49 = vshrl.u32 %v101_v45, 23  ;;  %v105_v51 = vand.u32 8388607, %v98_v44  ;;  %v206_v52 = vshrl.u32 %v205_v48, 23  ;;  %v209_v53 = vand.u32 8388607, %v202_v47 }
  0x91   :  { %v1106_v59 = vsub.f32 %v80_v37, %v92_v55  ;;  %vm1199_vm15 = vcmp.le.f32.partialorder %v98_v44, 0.7853982 }
  0x92   :  { %v950_v54 = vadd.s32 4294967169, %v102_v49  ;;  %v954_v56 = vadd.s32 4294967169, %v206_v52  ;;  %v106_v60 = vor.u32 8388608, %v105_v51  ;;  %v210_v61 = vor.u32 8388608, %v209_v53 }
  0x93   :  { %v309_v63 = vand.u32 2139095040, %v1106_v59  ;;  %v306_v8 = vand.u32 2147483647, %v1106_v59 }
  0x94   :  { %v108_v57 = vadd.s32 1, %v950_v54  ;;  %v212_v62 = vadd.s32 1, %v954_v56  ;;  %v1111_v5 = vshll.u32 %v106_v60, 8  ;;  %v1115_v7 = vshll.u32 %v210_v61, 8 }
  0x95   :  { %v1119_v13 = vshrl.u32 %v309_v63, 23 }
  0x96   :  { %vm109_vm0 = vcmp.gt.s32.totalorder %v108_v57, 0  ;;  %vm213_vm1 = vcmp.gt.s32.totalorder %v212_v62, 0 }
  0x97   :  { %v110_v0 = vsel %vm109_vm0, %v108_v57, 0  ;;  %v214_v3 = vsel %vm213_vm1, %v212_v62, 0  ;;  %vm1213_vm0 = vcmp.le.f32.partialorder %v202_v47, 0.7853982 }
  0x98   :  { %v111_v1 = vshrl.u32 %v110_v0, 5  ;;  %v112_v2 = vand.u32 31, %v110_v0  ;;  %v1113_v6 = vshrl.u32 %v214_v3, 5  ;;  %v216_v12 = vand.u32 31, %v214_v3 }
  0x9a   :  { %v113_v9 = vsub.s32 32, %v112_v2  ;;  %v115_v11 = vshll.u32 %v1058_v10, %v112_v2  ;;  %v118_v15 = vshll.u32 %v1059_v14, %v112_v2  ;;  %v121_v17 = vshll.u32 %v1060_v16, %v112_v2 }
  0x9b   :  { %v124_v19 = vshll.u32 %v1061_v18, %v112_v2  ;;  %v127_v21 = vshll.u32 %v1062_v20, %v112_v2  ;;  %vm130_vm2 = vcmp.lt.s32.totalorder %v111_v1, 1  ;;  %vm131_vm3 = vcmp.lt.s32.totalorder %v111_v1, 2 }
  0x9c   :  { %v116_v22 = vshrl.u32 %v1059_v14, %v113_v9  ;;  %v119_v23 = vshrl.u32 %v1060_v16, %v113_v9  ;;  %v122_v24 = vshrl.u32 %v1061_v18, %v113_v9  ;;  %v114_v25 = vshrl.u32 %v1058_v10, %v113_v9 }
  0x9d   :  { %v125_v26 = vshrl.u32 %v1062_v20, %v113_v9  ;;  %v128_v28 = vshrl.u32 %v1063_v27, %v113_v9  ;;  %v217_v32 = vsub.s32 32, %v216_v12  ;;  %vm132_vm4 = vcmp.lt.s32.totalorder %v111_v1, 3 }
  0x9e   :  { %v117_v29 = vor.u32 %v116_v22, %v115_v11  ;;  %v120_v30 = vor.u32 %v119_v23, %v118_v15  ;;  %v123_v31 = vor.u32 %v122_v24, %v121_v17  ;;  %vm133_vm5 = vcmp.lt.s32.totalorder %v111_v1, 4 }
  0x9f   :  { %v126_v33 = vor.u32 %v125_v26, %v124_v19  ;;  %v129_v34 = vor.u32 %v128_v28, %v127_v21  ;;  %v219_v46 = vshll.u32 %v1058_v10, %v216_v12  ;;  %v220_v50 = vshrl.u32 %v1059_v14, %v217_v32 }
  0xa0   :  { %v134_v35 = vsel %vm130_vm2, %v114_v25, %v117_v29  ;;  %v135_v36 = vsel %vm133_vm5, %v123_v31, 2102212464  ;;  %v138_v37 = vsel %vm130_vm2, %v117_v29, %v120_v30  ;;  %v142_v38 = vsel %vm130_vm2, %v120_v30, %v123_v31 }
  0xa1   :  { %v136_v39 = vsel %vm132_vm4, %v120_v30, %v135_v36  ;;  %v139_v40 = vsel %vm133_vm5, %v126_v33, 920167782  ;;  %v143_v45 = vsel %vm133_vm5, %v129_v34, 1326507024  ;;  %v222_v51 = vshll.u32 %v1059_v14, %v216_v12 }
  0xa2   :  { %v140_v48 = vsel %vm132_vm4, %v123_v31, %v139_v40  ;;  %v144_v49 = vsel %vm132_vm4, %v126_v33, %v143_v45  ;;  %v137_v52 = vsel %vm131_vm3, %v134_v35, %v136_v39  ;;  %v223_v55 = vshrl.u32 %v1060_v16, %v217_v32 }
  0xa3   :  { %v141_v53 = vsel %vm131_vm3, %v138_v37, %v140_v48  ;;  %v145_v54 = vsel %vm131_vm3, %v142_v38, %v144_v49  ;;  %v221_v61 = vor.u32 %v220_v50, %v219_v46  ;;  %v225_v63 = vshll.u32 %v1060_v16, %v216_v12 }
  0xa4   :  { %v1142_v56 = vmul.u32.u64.low %v1111_v5, %v145_v54  ;;  %v1143_v57 = vmul.u32.u64.high %v1111_v5, %v145_v54, %v1142_v56  ;;  %v1146_v58 = vmul.u32.u64.low %v1111_v5, %v141_v53  ;;  %v1147_v60 = vmul.u32.u64.high %v1111_v5, %v141_v53, %v1146_v58 }
  0xa5   :  { %v224_v62 = vor.u32 %v223_v55, %v222_v51  ;;  %v226_v0 = vshrl.u32 %v1061_v18, %v217_v32  ;;  %v218_v1 = vshrl.u32 %v1058_v10, %v217_v32  ;;  %v228_v2 = vshll.u32 %v1061_v18, %v216_v12 }
  0xa6   :  { %v229_v3 = vshrl.u32 %v1062_v20, %v217_v32  ;;  %v232_v9 = vshrl.u32 %v1063_v27, %v217_v32  ;;  %v153_v11 = vmul.u32 %v1111_v5, %v137_v52  ;;  %v231_v17 = vshll.u32 %v1062_v20, %v216_v12 }
  0xa7   :  { %v227_v15 = vor.u32 %v226_v0, %v225_v63  ;;  %vm234_vm6 = vcmp.lt.s32.totalorder %v1113_v6, 1  ;;  %vm155_vm7 = vc.u32 %v1143_v57, %v1146_v58  ;;  %v156_v19 = vadd.s32 1, %v1147_v60 }
  0xa8   :  { %v230_v21 = vor.u32 %v229_v3, %v228_v2  ;;  %vm235_vm8 = vcmp.lt.s32.totalorder %v1113_v6, 2  ;;  %v233_v22 = vor.u32 %v232_v9, %v231_v17  ;;  %vm236_vm9 = vcmp.lt.s32.totalorder %v1113_v6, 3 }
  0xa9   :  { %vm237_vm10 = vcmp.lt.s32.totalorder %v1113_v6, 4  ;;  %v242_v23 = vsel %vm234_vm6, %v221_v61, %v224_v62  ;;  %v157_v5 = vsel %vm155_vm7, %v156_v19, %v1147_v60  ;;  %v246_v25 = vsel %vm234_vm6, %v224_v62, %v227_v15 }
  0xaa   :  { %v239_v24 = vsel %vm237_vm10, %v227_v15, 2102212464  ;;  %v243_v12 = vsel %vm237_vm10, %v230_v21, 920167782  ;;  %v158_v26 = vadd.s32 %v157_v5, %v153_v11  ;;  %v238_v28 = vsel %vm234_vm6, %v218_v1, %v221_v61 }
  0xab   :  { %v244_v29 = vsel %vm236_vm9, %v227_v15, %v243_v12  ;;  %v247_v30 = vsel %vm237_vm10, %v233_v22, 1326507024  ;;  %v240_v31 = vsel %vm236_vm9, %v224_v62, %v239_v24  ;;  %v958_v34 = vadd.s32 4294967169, %v1119_v13 }
  0xac   :  { %v245_v32 = vsel %vm235_vm8, %v242_v23, %v244_v29  ;;  %v248_v33 = vsel %vm236_vm9, %v230_v21, %v247_v30  ;;  %v159_v35 = vadd.s32 536870912, %v158_v26  ;;  %v241_v46 = vsel %vm235_vm8, %v238_v28, %v240_v31 }
  0xad   :  { %v249_v36 = vsel %vm235_vm8, %v246_v25, %v248_v33  ;;  %v1172_v37 = vmul.u32.u64.low %v1115_v7, %v245_v32  ;;  %v1173_v38 = vmul.u32.u64.high %v1115_v7, %v245_v32, %v1172_v37  ;;  %v1183_v48 = vsub.f32 %v1095_v43, %v1109_v4 }
  0xae   :  { %v1176_v39 = vmul.u32.u64.low %v1115_v7, %v249_v36  ;;  %v1177_v40 = vmul.u32.u64.high %v1115_v7, %v249_v36, %v1176_v39  ;;  %v160_v45 = vshrl.u32 %v159_v35, 30  ;;  %v316_v13 = vadd.s32 1, %v958_v34 }
  0xaf   :  { %v260_v50 = vadd.s32 1, %v1173_v38  ;;  %v313_v51 = vand.u32 8388607, %v306_v8  ;;  %v257_v52 = vmul.u32 %v1115_v7, %v241_v46  ;;  %v413_v43 = vand.u32 2139095040, %v1183_v48 }
  0xb0   :  { %v161_v49 = vshll.u32 %v160_v45, 30  ;;  %vm317_vm11 = vcmp.gt.s32.totalorder %v316_v13, 0  ;;  %vm259_vm12 = vc.u32 %v1177_v40, %v1172_v37  ;;  %v184_v6 = vsub.s32 4, %v160_v45 }
  0xb1   :  { %v318_v53 = vsel %vm317_vm11, %v316_v13, 0  ;;  %v261_v55 = vsel %vm259_vm12, %v260_v50, %v1173_v38  ;;  %v314_v61 = vor.u32 8388608, %v313_v51  ;;  %v410_v63 = vand.u32 2147483647, %v1183_v48 }
  0xb2   :  { %v162_v54 = vsub.s32 %v158_v26, %v161_v49  ;;  %v262_v4 = vadd.s32 %v261_v55, %v257_v52  ;;  %v320_v56 = vand.u32 31, %v318_v53  ;;  %v185_v7 = vsel %vm100_vm13, %v184_v6, %v160_v45 }
  0xb3   :  { %v414_v2 = vshrl.u32 %v413_v43, 23  ;;  %v154_v11 = vadd.s32 %v1146_v58, %v1143_v57  ;;  %v1205_v17 = vshll.u32 %v314_v61, 8  ;;  %v1209_v19 = vsel %vm1199_vm15, 0, %v185_v7 }
  0xb4   :  { %v164_v60 = vsub.s32 0, %v162_v54  ;;  %v263_v62 = vadd.s32 536870912, %v262_v4  ;;  %v321_v1 = vsub.s32 32, %v320_v56  ;;  %v1218_v44 = vadd.s32 %v1172_v37, %v1177_v40 }
  0xb5   :  { %v1222_v57 = vand.u32 8388607, %v410_v63  ;;  %v1224_v23 = vshrl.u32 %v318_v53, 5  ;;  %v1227_v24 = vadd.s32 4294967169, %v414_v2  ;;  %v1234_v28 = vadd.s32 3, %v1209_v19 }
  0xb6   :  { %v951_v0 = vmin.u32 %v164_v60, %v162_v54  ;;  %v264_v3 = vshrl.u32 %v263_v62, 30  ;;  %v324_v5 = vshrl.u32 %v1059_v14, %v321_v1  ;;  %v327_v25 = vshrl.u32 %v1060_v16, %v321_v1 }
  0xb7   :  { %v330_v26 = vshrl.u32 %v1061_v18, %v321_v1  ;;  %v323_v29 = vshll.u32 %v1058_v10, %v320_v56  ;;  %v326_v30 = vshll.u32 %v1059_v14, %v320_v56  ;;  %v329_v33 = vshll.u32 %v1060_v16, %v320_v56 }
  0xb8   :  { %v166_v15 = vclz %v951_v0  ;;  %v265_v22 = vshll.u32 %v264_v3, 30  ;;  %v288_v47 = vsub.s32 4, %v264_v3  ;;  %v333_v34 = vshrl.u32 %v1062_v20, %v321_v1 }
  0xb9   :  { %v325_v37 = vor.u32 %v324_v5, %v323_v29  ;;  %v332_v38 = vshll.u32 %v1061_v18, %v320_v56  ;;  %v328_v45 = vor.u32 %v327_v25, %v326_v30  ;;  %v331_v46 = vor.u32 %v330_v26, %v329_v33 }
  0xba   :  { %v952_v58 = vadd.s32 4294967294, %v166_v15  ;;  %v1229_v12 = vsub.s32 %v262_v4, %v265_v22  ;;  %v289_v40 = vsel %vm204_vm14, %v288_v47, %v264_v3  ;;  %v336_v51 = vshrl.u32 %v1063_v27, %v321_v1 }
  0xbb   :  { %v334_v53 = vor.u32 %v333_v34, %v332_v38  ;;  %v335_v6 = vshll.u32 %v1062_v20, %v320_v56  ;;  %vm338_vm2 = vcmp.lt.s32.totalorder %v1224_v23, 1  ;;  %v291_v4 = vsel %vm1213_vm0, 0, %v289_v40 }
  0xbc   :  { %vm953_vm1 = vcmp.lt.s32.totalorder %v952_v58, 0  ;;  %v268_v32 = vsub.s32 0, %v1229_v12  ;;  %v322_v60 = vshrl.u32 %v1058_v10, %v321_v1  ;;  %vm339_vm3 = vcmp.lt.s32.totalorder %v1224_v23, 2 }
  0xbd   :  { %v169_v31 = vsel %vm953_vm1, 0, %v952_v58  ;;  %v337_v62 = vor.u32 %v336_v51, %v335_v6  ;;  %vm341_vm4 = vcmp.lt.s32.totalorder %v1224_v23, 4  ;;  %vm340_vm5 = vcmp.lt.s32.totalorder %v1224_v23, 3 }
  0xbe   :  { %v170_v35 = vsub.s32 32, %v169_v31  ;;  %v174_v36 = vsub.s32 4294967266, %v169_v31  ;;  %v955_v39 = vmin.u32 %v268_v32, %v1229_v12  ;;  %v171_v13 = vshll.u32 %v162_v54, %v169_v31 }
  0xbf   :  { %v343_v56 = vsel %vm341_vm4, %v331_v46, 2102212464  ;;  %v346_v0 = vsel %vm338_vm2, %v325_v37, %v328_v45  ;;  %v342_v1 = vsel %vm338_vm2, %v322_v60, %v325_v37  ;;  %v347_v2 = vsel %vm341_vm4, %v334_v53, 920167782 }
  0xc0   :  { %v172_v49 = vshrl.u32 %v154_v11, %v170_v35  ;;  %v175_v50 = vadd.s32 127, %v174_v36  ;;  %v270_v52 = vclz %v955_v39  ;;  %v344_v15 = vsel %vm340_vm5, %v328_v45, %v343_v56 }
  0xc1   :  { %v348_v22 = vsel %vm340_vm5, %v331_v46, %v347_v2  ;;  %v350_v25 = vsel %vm338_vm2, %v328_v45, %v331_v46  ;;  %v351_v29 = vsel %vm341_vm4, %v337_v62, 1326507024  ;;  %v345_v37 = vsel %vm339_vm3, %v342_v1, %v344_v15 }
  0xc2   :  { %v173_v55 = vor.u32 %v172_v49, %v171_v13  ;;  %v176_v43 = vshll.u32 %v175_v50, 23  ;;  %v956_v61 = vadd.s32 4294967294, %v270_v52  ;;  %v349_v47 = vsel %vm339_vm3, %v346_v0, %v348_v22 }
  0xc3   :  { %v1273_v30 = vmul.u32.u64.low %v1205_v17, %v349_v47  ;;  %v1274_v31 = vmul.u32.u64.high %v1205_v17, %v349_v47, %v1273_v30  ;;  %v352_v35 = vsel %vm340_vm5, %v334_v53, %v351_v29  ;;  %v420_v39 = vadd.s32 1, %v1227_v24 }
  0xc4   :  { %v177_v54 = vor.u32 4788187, %v176_v43  ;;  %v180_v7 = vcvt.s32.f32 %v173_v55  ;;  %vm957_vm6 = vcmp.lt.s32.totalorder %v956_v61, 0  ;;  %v353_v38 = vsel %vm339_vm3, %v350_v25, %v352_v35 }
  0xc5   :  { %v273_v11 = vsel %vm957_vm6, 0, %v956_v61  ;;  %v295_v13 = vadd.s32 3, %v291_v4  ;;  %v364_v49 = vadd.s32 1, %v1274_v31  ;;  %vm421_vm7 = vcmp.gt.s32.totalorder %v420_v39, 0 }
  0xc6   :  { %v178_v3 = vand.u32 2147483647, %v177_v54  ;;  %v274_v58 = vsub.s32 32, %v273_v11  ;;  %v278_v5 = vsub.s32 4294967266, %v273_v11  ;;  %v275_v32 = vshll.u32 %v1229_v12, %v273_v11 }
  0xc7   :  { %v1287_v46 = vmul.u32.u64.low %v1205_v17, %v353_v38  ;;  %v1288_v12 = vmul.u32.u64.high %v1205_v17, %v353_v38, %v1287_v46  ;;  %v1297_v24 = vand.u32 3, %v1209_v19  ;;  %v422_v51 = vsel %vm421_vm7, %v420_v39, 0 }
  0xc8   :  { %v181_v26 = vmul.f32 %v180_v7, %v178_v3  ;;  %v276_v33 = vshrl.u32 %v1218_v44, %v274_v58  ;;  %v279_v34 = vadd.s32 127, %v278_v5  ;;  %v1300_v52 = vand.u32 3, %v1234_v28 }
  0xc9   :  { %v361_v53 = vmul.u32 %v1205_v17, %v345_v37  ;;  %v424_v6 = vand.u32 31, %v422_v51  ;;  %vm363_vm8 = vc.u32 %v1288_v12, %v1273_v30  ;;  %v1305_v9 = vand.u32 3, %v295_v13 }
  0xca   :  { %v182_v36 = vxor.u32 2147483648, %v181_v26  ;;  %v277_v40 = vor.u32 %v276_v33, %v275_v32  ;;  %v280_v45 = vshll.u32 %v279_v34, 23  ;;  %v1307_v60 = vand.u32 3, %v291_v4 }
  0xcb   :  { %v365_v19 = vsel %vm363_vm8, %v364_v49, %v1274_v31  ;;  %v425_v61 = vsub.s32 32, %v424_v6  ;;  %v1310_v28 = vshrl.u32 %v422_v51, 5  ;;  %v427_v17 = vshll.u32 %v1058_v10, %v424_v6 }
  0xcc   :  { %v183_v44 = vsel %vm100_vm13, %v182_v36, %v181_v26  ;;  %v281_v50 = vor.u32 4788187, %v280_v45  ;;  %v284_v43 = vcvt.s32.f32 %v277_v40  ;;  %v366_v54 = vadd.s32 %v365_v19, %v361_v53 }
  0xcd   :  { %v186_v23 = vsel %vm1199_vm15, %v1091_v41, %v183_v44  ;;  %vm197_vm9 = vcmp.eq.s32.totalorder %v1300_v52, 2  ;;  %vm612_vm10 = vcmp.eq.s32.totalorder %v1297_v24, 2  ;;  %v428_v56 = vshrl.u32 %v1059_v14, %v425_v61 }
  0xce   :  { %1016 = vcosq.f32 %v186_v23  ;;  %v282_v55 = vand.u32 2147483647, %v281_v50  ;;  %v431_v0 = vshrl.u32 %v1060_v16, %v425_v61  ;;  %v433_v4 = vshll.u32 %v1060_v16, %v424_v6 }
  0xcf   :  { %1018 = vsinq.f32 %v186_v23  ;;  %v434_v7 = vshrl.u32 %v1061_v18, %v425_v61  ;;  %vm194_vm11 = vcmp.eq.s32.totalorder %v1300_v52, 0  ;;  %vm609_vm12 = vcmp.eq.s32.totalorder %v1297_v24, 0 }
  0xd0   :  { %v285_v62 = vmul.f32 %v284_v43, %v282_v55  ;;  %v367_v2 = vadd.s32 536870912, %v366_v54  ;;  %v430_v3 = vshll.u32 %v1059_v14, %v424_v6  ;;  %v437_v11 = vshrl.u32 %v1062_v20, %v425_v61 }
  0xd1   :  { %vm193_vm13 = vcmp.lt.s32.totalorder %v1300_v52, 2  ;;  %vm608_vm15 = vcmp.lt.s32.totalorder %v1297_v24, 2  ;;  %v418_v15 = vor.u32 8388608, %v1222_v57  ;;  %v429_v22 = vor.u32 %v428_v56, %v427_v17 }
  0xd2   :  { %v286_v1 = vxor.u32 2147483648, %v285_v62  ;;  %v435_v16 = vor.u32 %v434_v7, %v433_v4  ;;  %v436_v58 = vshll.u32 %v1061_v18, %v424_v6  ;;  %vm190_vm1 = vweird.f32 %v1091_v41 }
  0xd3   :  { %v1330_v47 = vshrl.u32 %v367_v2, 30  ;;  %v426_v14 = vshrl.u32 %v1058_v10, %v425_v61  ;;  %v432_v25 = vor.u32 %v431_v0, %v430_v3  ;;  %v439_v57 = vshll.u32 %v1062_v20, %v424_v6 }
  0xd4   :  { %v287_v5 = vsel %vm204_vm14, %v286_v1, %v285_v62  ;;  %v438_v29 = vor.u32 %v437_v11, %v436_v58  ;;  %v440_v31 = vshrl.u32 %v1063_v27, %v425_v61  ;;  %vm442_vm2 = vcmp.lt.s32.totalorder %v1310_v28, 1 }
  0xd5   :  { %v290_v26 = vsel %vm1213_vm0, %v1093_v42, %v287_v5  ;;  %v369_v18 = vshll.u32 %v1330_v47, 30  ;;  %vm445_vm14 = vcmp.lt.s32.totalorder %v1310_v28, 4  ;;  %vm444_vm3 = vcmp.lt.s32.totalorder %v1310_v28, 3 }
  0xd6   :  { %1020 = vcosq.f32 %v290_v26  ;;  %v446_v10 = vsel %vm442_vm2, %v426_v14, %v429_v22  ;;  %v447_v21 = vsel %vm445_vm14, %v435_v16, 2102212464  ;;  %vm443_vm0 = vcmp.lt.s32.totalorder %v1310_v28, 2 }
  0xd7   :  { %1022 = vsinq.f32 %v290_v26  ;;  %v1346_v27 = vsub.s32 %v366_v54, %v369_v18  ;;  %v448_v34 = vsel %vm444_vm3, %v432_v25, %v447_v21  ;;  %v441_v36 = vor.u32 %v440_v31, %v439_v57 }
  0xd8   :  { %v1017_v32 = vpop.eup %1016  ;;  %v1353_v37 = vsel %vm443_vm0, %v446_v10, %v448_v34  ;;  %v451_v38 = vsel %vm445_vm14, %v438_v29, 920167782  ;;  %v450_v46 = vsel %vm442_vm2, %v429_v22, %v432_v25  ;;  %v458_v23 = vshll.u32 %v418_v15, 8 }
  0xd9   :  { %v1019_v20 = vpop.eup %1018  ;;  %v198_v33 = vxor.u32 2147483648, %v1017_v32  ;;  %v372_v45 = vsub.s32 0, %v1346_v27  ;;  %v452_v49 = vsel %vm444_vm3, %v435_v16, %v451_v38  ;;  %v454_v6 = vsel %vm442_vm2, %v432_v25, %v435_v16 }
  0xda   :  { %v195_v35 = vxor.u32 2147483648, %v1019_v20  ;;  %v453_v19 = vsel %vm443_vm0, %v450_v46, %v452_v49  ;;  %v455_v52 = vsel %vm445_vm14, %v441_v36, 1326507024  ;;  %vm294_vm4 = vweird.f32 %v1093_v42 }
  0xdb   :  { %v199_v39 = vsel %vm197_vm9, %v198_v33, %v1019_v20  ;;  %v614_v40 = vsel %vm612_vm10, %v198_v33, %v1019_v20  ;;  %v959_v53 = vmin.u32 %v372_v45, %v1346_v27  ;;  %vm711_vm5 = vcmp.lt.s32.totalorder %v1307_v60, 2 }
  0xdc   :  { %v196_v44 = vsel %vm194_vm11, %v1017_v32, %v195_v35  ;;  %v611_v13 = vsel %vm609_vm12, %v1017_v32, %v195_v35  ;;  %vm712_vm6 = vcmp.eq.s32.totalorder %v1307_v60, 0  ;;  %v456_v61 = vsel %vm444_vm3, %v438_v29, %v455_v52 }
  0xdd   :  { %v200_v50 = vsel %vm193_vm13, %v196_v44, %v199_v39  ;;  %v615_v51 = vsel %vm608_vm15, %v611_v13, %v614_v40  ;;  %v374_v24 = vclz %v959_v53  ;;  %vm297_vm7 = vcmp.lt.s32.totalorder %v1305_v9, 2 }
  0xde   :  { %v201_v55 = vsel %vm190_vm1, nan, %v200_v50  ;;  %v616_v43 = vsel %vm190_vm1, nan, %v615_v51  ;;  %v1390_v41 = vmul.u32.u64.low %v458_v23, %v453_v19  ;;  %v1391_v62 = vmul.u32.u64.high %v458_v23, %v453_v19, %v1390_v41 }
  0xdf   :  { %926 = vst [vmem:[#allocation2] sm:$0xff] %v201_v55  ;;  %930 = vst [vmem:[#allocation2 + $0x10] sm:$0xff] %v616_v43  ;;  %vm715_vm8 = vcmp.eq.s32.totalorder %v1307_v60, 2  ;;  %v960_v17 = vadd.s32 4294967294, %v374_v24  ;;  %v457_v56 = vsel %vm443_vm0, %v454_v6, %v456_v61  ;;  %vm298_vm9 = vcmp.eq.s32.totalorder %v1305_v9, 0 }
  0xe0   :  { %v1021_v54 = vpop.eup %1020  ;;  %v1398_v7 = vmul.u32.u64.low %v458_v23, %v457_v56  ;;  %v1399_v1 = vmul.u32.u64.high %v458_v23, %v457_v56, %v1398_v7  ;;  %vm301_vm10 = vcmp.eq.s32.totalorder %v1305_v9, 2  ;;  %v362_v3 = vadd.s32 %v1273_v30, %v1288_v12 }
  0xe1   :  { %v1023_v0 = vpop.eup %1022  ;;  %v302_v4 = vxor.u32 2147483648, %v1021_v54  ;;  %vm961_vm11 = vcmp.lt.s32.totalorder %v960_v17, 0  ;;  %v468_v28 = vadd.s32 1, %v1391_v62  ;;  %v465_v14 = vmul.u32 %v458_v23, %v1353_v37 }
  0xe2   :  { %v299_v2 = vxor.u32 2147483648, %v1023_v0  ;;  %v377_v22 = vsel %vm961_vm11, 0, %v960_v17  ;;  %v466_v12 = vadd.s32 %v1390_v41, %v1399_v1  ;;  %vm467_vm12 = vc.u32 %v1399_v1, %v1390_v41 }
  0xe3   :  { %v303_v11 = vsel %vm301_vm10, %v302_v4, %v1023_v0  ;;  %v717_v15 = vsel %vm715_vm8, %v302_v4, %v1023_v0  ;;  %v378_v5 = vsub.s32 32, %v377_v22  ;;  %v382_v30 = vsub.s32 4294967266, %v377_v22 }
  0xe4   :  { %v300_v16 = vsel %vm298_vm9, %v1021_v54, %v299_v2  ;;  %v714_v58 = vsel %vm712_vm6, %v1021_v54, %v299_v2  ;;  %v379_v9 = vshll.u32 %v1346_v27, %v377_v22  ;;  %v469_v60 = vsel %vm467_vm12, %v468_v28, %v1391_v62 }
  0xe5   :  { %v304_v25 = vsel %vm297_vm7, %v300_v16, %v303_v11  ;;  %v718_v26 = vsel %vm711_vm5, %v714_v58, %v717_v15  ;;  %v380_v31 = vshrl.u32 %v362_v3, %v378_v5  ;;  %v383_v18 = vadd.s32 127, %v382_v30 }
  0xe6   :  { %v305_v29 = vsel %vm294_vm4, nan, %v304_v25  ;;  %v719_v57 = vsel %vm294_vm4, nan, %v718_v26  ;;  %v470_v32 = vadd.s32 %v469_v60, %v465_v14  ;;  %v392_v38 = vsub.s32 4, %v1330_v47 }
  0xe7   :  { %927 = vst [vmem:[#allocation2 + $0x8] sm:$0xff] %v305_v29  ;;  %931 = vst [vmem:[#allocation2 + $0x18] sm:$0xff] %v719_v57  ;;  %v381_v10 = vor.u32 %v380_v31, %v379_v9  ;;  %v384_v21 = vshll.u32 %v383_v18, 23  ;;  %vm308_vm13 = vcmp.lt.s32.totalorder %v1106_v59, 0  ;;  %vm307_vm15 = vcmp.le.f32.partialorder %v306_v8, 0.7853982 }
  0xe8   :  { %v471_v20 = vadd.s32 536870912, %v470_v32  ;;  %v393_v46 = vsel %vm308_vm13, %v392_v38, %v1330_v47  ;;  %vm398_vm2 = vweird.f32 %v1106_v59  ;;  %vm412_vm7 = vcmp.lt.s32.totalorder %v1183_v48, 0 }
  0xe9   :  { %v385_v33 = vor.u32 4788187, %v384_v21  ;;  %v388_v42 = vcvt.s32.f32 %v381_v10  ;;  %v395_v49 = vsel %vm307_vm15, 0, %v393_v46  ;;  %vm411_vm8 = vcmp.le.f32.partialorder %v410_v63, 0.7853982 }
  0xea   :  { %v1420_v34 = vshrl.u32 %v471_v20, 30  ;;  %v399_v51 = vadd.s32 3, %v395_v49  ;;  %v813_v19 = vand.u32 3, %v395_v49 }
  0xeb   :  { %v386_v35 = vand.u32 2147483647, %v385_v33 }
  0xec   :  { %v473_v36 = vshll.u32 %v1420_v34, 30  ;;  %v400_v43 = vand.u32 3, %v399_v51  ;;  %vm818_vm0 = vcmp.eq.s32.totalorder %v813_v19, 2  ;;  %vm815_vm4 = vcmp.eq.s32.totalorder %v813_v19, 0 }
  0xed   :  { %v389_v37 = vmul.f32 %v388_v42, %v386_v35  ;;  %vm814_vm6 = vcmp.lt.s32.totalorder %v813_v19, 2  ;;  %v496_v58 = vsub.s32 4, %v1420_v34 }
  0xee   :  { %v474_v39 = vsub.s32 %v470_v32, %v473_v36  ;;  %vm402_vm14 = vcmp.eq.s32.totalorder %v400_v43, 0  ;;  %vm405_vm3 = vcmp.eq.s32.totalorder %v400_v43, 2  ;;  %vm401_vm5 = vcmp.lt.s32.totalorder %v400_v43, 2 }
  0xef   :  { %v390_v40 = vxor.u32 2147483648, %v389_v37  ;;  %v497_v25 = vsel %vm412_vm7, %v496_v58, %v1420_v34 }
  0xf0   :  { %v476_v27 = vsub.s32 0, %v474_v39  ;;  %v499_v30 = vsel %vm411_vm8, 0, %v497_v25 }
  0xf1   :  { %v391_v45 = vsel %vm308_vm13, %v390_v40, %v389_v37  ;;  %v916_v29 = vand.u32 3, %v499_v30 }
  0xf2   :  { %v394_v44 = vsel %vm307_vm15, %v1106_v59, %v391_v45  ;;  %v963_v13 = vmin.u32 %v476_v27, %v474_v39  ;;  %v503_v59 = vadd.s32 3, %v499_v30 }
  0xf3   :  { %1024 = vcosq.f32 %v394_v44  ;;  %vm921_vm10 = vcmp.eq.s32.totalorder %v916_v29, 2  ;;  %vm918_vm12 = vcmp.eq.s32.totalorder %v916_v29, 0  ;;  %vm917_vm15 = vcmp.lt.s32.totalorder %v916_v29, 2 }
  0xf4   :  { %1026 = vsinq.f32 %v394_v44  ;;  %v478_v23 = vclz %v963_v13 }
  0xf6   :  { %v964_v50 = vadd.s32 4294967294, %v478_v23 }
  0xf8   :  { %vm965_vm1 = vcmp.lt.s32.totalorder %v964_v50, 0 }
  0xf9   :  { %v481_v53 = vsel %vm965_vm1, 0, %v964_v50  ;;  %vm502_vm1 = vweird.f32 %v1183_v48 }
  0xfa   :  { %v482_v6 = vsub.s32 32, %v481_v53  ;;  %v486_v55 = vsub.s32 4294967266, %v481_v53  ;;  %v483_v52 = vshll.u32 %v474_v39, %v481_v53 }
  0xfc   :  { %v484_v8 = vshrl.u32 %v466_v12, %v482_v6  ;;  %v487_v24 = vadd.s32 127, %v486_v55  ;;  %v504_v12 = vand.u32 3, %v503_v59 }
  0xfd   :  { %v1025_v61 = vpop.eup %1024 }
  0xfe   :  { %v1027_v47 = vpop.eup %1026  ;;  %v406_v41 = vxor.u32 2147483648, %v1025_v61  ;;  %v485_v62 = vor.u32 %v484_v8, %v483_v52  ;;  %v488_v54 = vshll.u32 %v487_v24, 23  ;;  %vm509_vm9 = vcmp.eq.s32.totalorder %v504_v12, 2 }
  0xff   :  { %v403_v17 = vxor.u32 2147483648, %v1027_v47  ;;  %vm506_vm11 = vcmp.eq.s32.totalorder %v504_v12, 0  ;;  %vm505_vm13 = vcmp.lt.s32.totalorder %v504_v12, 2 }
 0x100   :  { %v407_v56 = vsel %vm405_vm3, %v406_v41, %v1027_v47  ;;  %v489_v0 = vor.u32 4788187, %v488_v54  ;;  %v820_v4 = vsel %vm818_vm0, %v406_v41, %v1027_v47  ;;  %v492_v11 = vcvt.s32.f32 %v485_v62 }
 0x101   :  { %v404_v7 = vsel %vm402_vm14, %v1025_v61, %v403_v17  ;;  %v817_v1 = vsel %vm815_vm4, %v1025_v61, %v403_v17 }
 0x102   :  { %v408_v2 = vsel %vm401_vm5, %v404_v7, %v407_v56  ;;  %v490_v3 = vand.u32 2147483647, %v489_v0  ;;  %v821_v15 = vsel %vm814_vm6, %v817_v1, %v820_v4 }
 0x103   :  { %v409_v22 = vsel %vm398_vm2, nan, %v408_v2  ;;  %v822_v28 = vsel %vm398_vm2, nan, %v821_v15 }
 0x104   :  { %v493_v16 = vmul.f32 %v492_v11, %v490_v3  ;;  %928 = vst [vmem:[#allocation2 + $0x20] sm:$0xff] %v409_v22  ;;  %932 = vst [vmem:[#allocation2 + $0x30] sm:$0xff] %v822_v28 }
 0x106   :  { %v494_v5 = vxor.u32 2147483648, %v493_v16 }
 0x108   :  { %v495_v14 = vsel %vm412_vm7, %v494_v5, %v493_v16 }
 0x109   :  { %v498_v26 = vsel %vm411_vm8, %v1183_v48, %v495_v14 }
 0x10a   :  { %1028 = vcosq.f32 %v498_v26 }
 0x10b   :  { %1030 = vsinq.f32 %v498_v26 }
 0x114   :  { %v1029_v57 = vpop.eup %1028 }
 0x115   :  { %v1031_v31 = vpop.eup %1030  ;;  %v510_v9 = vxor.u32 2147483648, %v1029_v57 }
 0x116   :  { %v507_v18 = vxor.u32 2147483648, %v1031_v31 }
 0x117   :  { %v511_v63 = vsel %vm509_vm9, %v510_v9, %v1031_v31  ;;  %v923_v60 = vsel %vm921_vm10, %v510_v9, %v1031_v31 }
 0x118   :  { %v508_v32 = vsel %vm506_vm11, %v1029_v57, %v507_v18  ;;  %v920_v10 = vsel %vm918_vm12, %v1029_v57, %v507_v18 }
 0x119   :  { %v512_v21 = vsel %vm505_vm13, %v508_v32, %v511_v63  ;;  %v924_v20 = vsel %vm917_vm15, %v920_v10, %v923_v60 }
 0x11a   :  { %v513_v33 = vsel %vm502_vm1, nan, %v512_v21  ;;  %v925_v34 = vsel %vm502_vm1, nan, %v924_v20 }
 0x11b   :  { %929 = vst [vmem:[#allocation2 + $0x28] sm:$0xff] %v513_v33  ;;  %933 = vst [vmem:[#allocation2 + $0x38] sm:$0xff] %v925_v34 }
 0x11c   :  { %1043 = shalt.err (!%p1040_p4)
}
 0x11d   :  { %s1044_s18 = scalar_lea.hbm %s1455_s2, 1024 }
 0x11e   :  { %p1045_p5 = scmp.ne.s32.totalorder %s1455_s2, %s1044_s18  ;;  %p1048_p6 = scmp.lt.u32.totalorder %s1044_s18, %s1455_s2 }
 0x120   :  { %p1050_p7 = pnand %p1048_p6, %p1045_p5 }
 0x122   :  { %1053 = shalt.err (!%p1050_p7)
}
 0x123   :  { %s1065_s23 = smov 512   ;;  %s1066_s24 = smov 32  }
 0x124   :  { %945 = dma.vmem_to_hbm [thread:$0]  %s940_s1, 1024, %s1455_s2, [#allocation3], %s1065_s23, %s1065_s23, %s1066_s24  }
 0x125   :  { %1054 = dma.done.wait [#allocation3], 1024  }
 0x126   :  { %1055 = vsyncadd [#allocation3], 4294966272 }
 0x127   :  { %949 = vsyncpa [#allocation3], 1 }

</bundles_post_ra>
